<compile_context>
chip_gen: v6e
topology: v6e:2x2x1
jax: 0.10.0
libtpu: 0.0.40
codegen_flags: <defaults>
</compile_context>

<pallas_src>
import functools

import jax
import jax.numpy as jnp
from jax import lax
from jax.experimental import pallas as pl
from jax.experimental.pallas import tpu as pltpu


def cheap_conv_kernel(x_ref, wdw_ref, bdw_ref, wpw_ref, bpw_ref, o_ref, *, H, W):
    # x_ref  : (1, Cin, H*W)   one batch item, NCHW with spatial flattened on lanes
    # wdw_ref: (Cin, 9)        depthwise 3x3 weights, tap index t = 3*ky + kx
    # bdw_ref: (Cin, 1)        depthwise bias
    # wpw_ref: (Cout, Cin)     pointwise (1x1) weights
    # bpw_ref: (Cout, 1)       pointwise bias
    # o_ref  : (1, Cout, H*W)
    Cin = x_ref.shape[1]
    Cout = o_ref.shape[1]
    HW = H * W

    x = x_ref[0].astype(jnp.float32)                      # (Cin, HW)

    # Zero halo for the 3x3 taps, built in VMEM (no extra HBM pass).
    # xp[:, k] == x[:, k - (W+1)] for k in [W+1, W+1+HW), zero otherwise.
    zpad = jnp.zeros((Cin, W + 1), jnp.float32)
    xp = jnp.concatenate([zpad, x, zpad], axis=1)         # (Cin, HW + 2W + 2)

    # Column masks: guard horizontal taps against wrap-around across rows.
    col = lax.broadcasted_iota(jnp.int32, (1, HW), 1) % W
    not_left_edge = (col >= 1).astype(jnp.float32)        # source col j-1 valid
    not_right_edge = (col <= W - 2).astype(jnp.float32)   # source col j+1 valid

    # Depthwise 3x3 cross-correlation + bias + ReLU (VPU, lane-dense).
    acc = jnp.zeros((Cin, HW), jnp.float32)
    for dy in (-1, 0, 1):
        for dx in (-1, 0, 1):
            # src[c, p] = x[c, p + dy*W + dx]  (zeros above/below the image)
            start = (W + 1) + dy * W + dx
            src = xp[:, start:start + HW]
            if dx == -1:
                src = src * not_left_edge
            elif dx == 1:
                src = src * not_right_edge
            t = 3 * (dy + 1) + (dx + 1)
            acc = acc + src * wdw_ref[:, t:t + 1]          # (Cin,1) lane-broadcast
    dw = jnp.maximum(acc + bdw_ref[...], 0.0)              # (Cin, HW), ReLU

    # Pointwise 1x1 conv + bias + ReLU as Cin broadcast-FMAs into a lane-dense
    # (Cout, HW) accumulator (channel counts are far too small for the MXU).
    y = wpw_ref[:, 0:1] * dw[0:1, :]                       # (Cout,1)*(1,HW) -> (Cout,HW)
    for ci in range(1, Cin):
        y = y + wpw_ref[:, ci:ci + 1] * dw[ci:ci + 1, :]
    y = jnp.maximum(y + bpw_ref[...], 0.0)

    o_ref[0] = y.astype(o_ref.dtype)                       # unmasked lane-dense store


def cheap_conv(x_nchw, w_dw, b_dw, w_pw, b_pw):
    """Forward pass of CheapConv(activated=True).

    x_nchw: (N, Cin, H, W) float32
    w_dw  : (Cin, 1, 3, 3)   PyTorch depthwise conv weight
    b_dw  : (Cin,)
    w_pw  : (Cout, Cin, 1, 1) PyTorch 1x1 conv weight
    b_pw  : (Cout,)
    returns (N, Cout, H, W)
    """
    N, Cin, H, W = x_nchw.shape
    Cout = w_pw.shape[0]
    HW = H * W

    # Free layout plumbing: NCHW is contiguous, so these reshapes are metadata
    # only -- no transposes, no padded HBM copy.
    x = x_nchw.reshape(N, Cin, HW)
    wdw = w_dw[:, 0, :, :].reshape(Cin, 9)                 # tap t = 3*ky + kx
    bdw = b_dw.reshape(Cin, 1)
    wpw = w_pw[:, :, 0, 0]                                 # (Cout, Cin)
    bpw = b_pw.reshape(Cout, 1)

    kernel = functools.partial(cheap_conv_kernel, H=H, W=W)

    out = pl.pallas_call(
        kernel,
        out_shape=jax.ShapeDtypeStruct((N, Cout, HW), x_nchw.dtype),
        grid_spec=pltpu.PrefetchScalarGridSpec(
            num_scalar_prefetch=0,
            grid=(N,),
            in_specs=[
                pl.BlockSpec((1, Cin, HW), lambda n: (n, 0, 0)),
                pl.BlockSpec((Cin, 9), lambda n: (0, 0)),
                pl.BlockSpec((Cin, 1), lambda n: (0, 0)),
                pl.BlockSpec((Cout, Cin), lambda n: (0, 0)),
                pl.BlockSpec((Cout, 1), lambda n: (0, 0)),
            ],
            out_specs=pl.BlockSpec((1, Cout, HW), lambda n: (n, 0, 0)),
        ),
        compiler_params=pltpu.CompilerParams(
            dimension_semantics=("parallel",)),
    )(x, wdw, bdw, wpw, bpw)

    return out.reshape(N, Cout, H, W)                      # stays NCHW, free


def reference(x_nchw, w_dw, b_dw, w_pw, b_pw):
    """Pure-JAX reference matching the PyTorch module (NCHW)."""
    Cin = x_nchw.shape[1]
    dn = lax.conv_dimension_numbers(x_nchw.shape, w_dw.shape,
                                    ("NCHW", "OIHW", "NCHW"))
    y = lax.conv_general_dilated(x_nchw, w_dw, (1, 1), ((1, 1), (1, 1)),
                                 dimension_numbers=dn,
                                 feature_group_count=Cin)
    y = jax.nn.relu(y + b_dw.reshape(1, -1, 1, 1))
    dn2 = lax.conv_dimension_numbers(y.shape, w_pw.shape,
                                     ("NCHW", "OIHW", "NCHW"))
    z = lax.conv_general_dilated(y, w_pw, (1, 1), ((0, 0), (0, 0)),
                                 dimension_numbers=dn2)
    return jax.nn.relu(z + b_pw.reshape(1, -1, 1, 1))


if __name__ == "__main__":
    key = jax.random.PRNGKey(0)
    k_x, k_wdw, k_bdw, k_wpw, k_bpw = jax.random.split(key, 5)

    N, Cin, Cout, H, W = 2, 4, 8, 16, 16

    x = jax.random.normal(k_x, (N, Cin, H, W), jnp.float32)
    # Deterministic parameter init (synthetic; module __init__ defines shapes).
    w_dw = jax.random.normal(k_wdw, (Cin, 1, 3, 3), jnp.float32) * 0.3
    b_dw = jax.random.normal(k_bdw, (Cin,), jnp.float32) * 0.1
    w_pw = jax.random.normal(k_wpw, (Cout, Cin, 1, 1), jnp.float32) * 0.3
    b_pw = jax.random.normal(k_bpw, (Cout,), jnp.float32) * 0.1

    out = jax.block_until_ready(cheap_conv(x, w_dw, b_dw, w_pw, b_pw))
    ref = jax.block_until_ready(reference(x, w_dw, b_dw, w_pw, b_pw))

    assert out.shape == (N, Cout, H, W)
    assert jnp.allclose(out, ref, atol=1e-5, rtol=1e-5)

    print("KERNEL_OK")
</pallas_src>

<mosaic_0001>
module attributes {stable_mosaic.version = 11 : i64} {
  func.func @cheap_conv_kernel(%arg0: i32, %arg1: memref<1x4x256xf32, #tpu.memory_space<vmem>>, %arg2: memref<4x9xf32, #tpu.memory_space<vmem>>, %arg3: memref<4x1xf32, #tpu.memory_space<vmem>>, %arg4: memref<8x4xf32, #tpu.memory_space<vmem>>, %arg5: memref<8x1xf32, #tpu.memory_space<vmem>>, %arg6: memref<1x8x256xf32, #tpu.memory_space<vmem>>) attributes {dimension_semantics = [#tpu.dimension_semantics<parallel>], iteration_bounds = array<i64: 2>, scalar_prefetch = 0 : i64, scratch_operands = 0 : i64, tpu.core_type = #tpu.core_type<tc>, window_params = [{transform_indices = @transform_0, window_bounds = array<i64: 1, 4, 256>}, {pipeline_mode = #tpu.pipeline_mode<synchronous>, transform_indices = @transform_1, window_bounds = array<i64: 4, 9>}, {pipeline_mode = #tpu.pipeline_mode<synchronous>, transform_indices = @transform_2, window_bounds = array<i64: 4, 1>}, {pipeline_mode = #tpu.pipeline_mode<synchronous>, transform_indices = @transform_3, window_bounds = array<i64: 8, 4>}, {pipeline_mode = #tpu.pipeline_mode<synchronous>, transform_indices = @transform_4, window_bounds = array<i64: 8, 1>}, {transform_indices = @transform_5, window_bounds = array<i64: 1, 8, 256>}]} {
    %c0 = arith.constant 0 : index
    %c0_0 = arith.constant 0 : index
    %c0_1 = arith.constant 0 : index
    %0 = vector.load %arg1[%c0, %c0_0, %c0_1] : memref<1x4x256xf32, #tpu.memory_space<vmem>>, vector<1x4x256xf32>
    %1 = vector.shape_cast %0 : vector<1x4x256xf32> to vector<4x256xf32>
    %cst = arith.constant 0.000000e+00 : f32
    %2 = vector.broadcast %cst : f32 to vector<4x17xf32>
    %3 = tpu.concatenate %2, %1, %2 in 1 : vector<4x17xf32>, vector<4x256xf32>, vector<4x17xf32> -> vector<4x290xf32>
    %4 = tpu.iota {dimensions = array<i32: 1>} : vector<1x256xi32>
    %c16_i32 = arith.constant 16 : i32
    %c0_i32 = arith.constant 0 : i32
    %5 = arith.cmpi eq, %c16_i32, %c0_i32 : i32
    %c1_i32 = arith.constant 1 : i32
    %6 = arith.select %5, %c1_i32, %c16_i32 : i32
    %7 = vector.broadcast %6 : i32 to vector<1x256xi32>
    %8 = arith.remsi %4, %7 : vector<1x256xi32>
    %c0_i32_2 = arith.constant 0 : i32
    %9 = vector.broadcast %c0_i32_2 : i32 to vector<1x256xi32>
    %10 = arith.cmpi ne, %8, %9 : vector<1x256xi32>
    %c0_i32_3 = arith.constant 0 : i32
    %11 = vector.broadcast %c0_i32_3 : i32 to vector<1x256xi32>
    %12 = arith.cmpi slt, %8, %11 : vector<1x256xi32>
    %c0_i32_4 = arith.constant 0 : i32
    %13 = arith.cmpi slt, %6, %c0_i32_4 : i32
    %14 = vector.broadcast %13 : i1 to vector<1x256xi1>
    %15 = vector.broadcast %14 : vector<1x256xi1> to vector<1x256xi1>
    %16 = arith.xori %12, %15 : vector<1x256xi1>
    %17 = arith.andi %16, %10 : vector<1x256xi1>
    %18 = vector.broadcast %6 : i32 to vector<1x256xi32>
    %19 = arith.addi %8, %18 : vector<1x256xi32>
    %20 = arith.select %17, %19, %8 : vector<1x256xi1>, vector<1x256xi32>
    %c1_i32_5 = arith.constant 1 : i32
    %21 = vector.broadcast %c1_i32_5 : i32 to vector<1x256xi32>
    %22 = arith.cmpi sge, %20, %21 : vector<1x256xi32>
    %23 = arith.extui %22 : vector<1x256xi1> to vector<1x256xi32>
    %24 = arith.sitofp %23 : vector<1x256xi32> to vector<1x256xf32>
    %c14_i32 = arith.constant 14 : i32
    %25 = vector.broadcast %c14_i32 : i32 to vector<1x256xi32>
    %26 = arith.cmpi sle, %20, %25 : vector<1x256xi32>
    %27 = arith.extui %26 : vector<1x256xi1> to vector<1x256xi32>
    %28 = arith.sitofp %27 : vector<1x256xi32> to vector<1x256xf32>
    %cst_6 = arith.constant 0.000000e+00 : f32
    %29 = vector.broadcast %cst_6 : f32 to vector<4x256xf32>
    %30 = vector.extract_strided_slice %3 {offsets = [0, 0], sizes = [4, 256], strides = [1, 1]} : vector<4x290xf32> to vector<4x256xf32>
    %31 = vector.broadcast %24 : vector<1x256xf32> to vector<4x256xf32>
    %32 = arith.mulf %30, %31 : vector<4x256xf32>
    %c0_7 = arith.constant 0 : index
    %c0_8 = arith.constant 0 : index
    %33 = vector.load %arg2[%c0_7, %c0_8] : memref<4x9xf32, #tpu.memory_space<vmem>>, vector<4x1xf32>
    %34 = vector.broadcast %33 : vector<4x1xf32> to vector<4x256xf32>
    %35 = arith.mulf %32, %34 : vector<4x256xf32>
    %36 = arith.addf %29, %35 : vector<4x256xf32>
    %37 = vector.extract_strided_slice %3 {offsets = [0, 1], sizes = [4, 256], strides = [1, 1]} : vector<4x290xf32> to vector<4x256xf32>
    %c0_9 = arith.constant 0 : index
    %c1 = arith.constant 1 : index
    %38 = vector.load %arg2[%c0_9, %c1] : memref<4x9xf32, #tpu.memory_space<vmem>>, vector<4x1xf32>
    %39 = vector.broadcast %38 : vector<4x1xf32> to vector<4x256xf32>
    %40 = arith.mulf %37, %39 : vector<4x256xf32>
    %41 = arith.addf %36, %40 : vector<4x256xf32>
    %42 = vector.extract_strided_slice %3 {offsets = [0, 2], sizes = [4, 256], strides = [1, 1]} : vector<4x290xf32> to vector<4x256xf32>
    %43 = vector.broadcast %28 : vector<1x256xf32> to vector<4x256xf32>
    %44 = arith.mulf %42, %43 : vector<4x256xf32>
    %c0_10 = arith.constant 0 : index
    %c2 = arith.constant 2 : index
    %45 = vector.load %arg2[%c0_10, %c2] : memref<4x9xf32, #tpu.memory_space<vmem>>, vector<4x1xf32>
    %46 = vector.broadcast %45 : vector<4x1xf32> to vector<4x256xf32>
    %47 = arith.mulf %44, %46 : vector<4x256xf32>
    %48 = arith.addf %41, %47 : vector<4x256xf32>
    %49 = vector.extract_strided_slice %3 {offsets = [0, 16], sizes = [4, 256], strides = [1, 1]} : vector<4x290xf32> to vector<4x256xf32>
    %50 = vector.broadcast %24 : vector<1x256xf32> to vector<4x256xf32>
    %51 = arith.mulf %49, %50 : vector<4x256xf32>
    %c0_11 = arith.constant 0 : index
    %c3 = arith.constant 3 : index
    %52 = vector.load %arg2[%c0_11, %c3] : memref<4x9xf32, #tpu.memory_space<vmem>>, vector<4x1xf32>
    %53 = vector.broadcast %52 : vector<4x1xf32> to vector<4x256xf32>
    %54 = arith.mulf %51, %53 : vector<4x256xf32>
    %55 = arith.addf %48, %54 : vector<4x256xf32>
    %56 = vector.extract_strided_slice %3 {offsets = [0, 17], sizes = [4, 256], strides = [1, 1]} : vector<4x290xf32> to vector<4x256xf32>
    %c0_12 = arith.constant 0 : index
    %c4 = arith.constant 4 : index
    %57 = vector.load %arg2[%c0_12, %c4] : memref<4x9xf32, #tpu.memory_space<vmem>>, vector<4x1xf32>
    %58 = vector.broadcast %57 : vector<4x1xf32> to vector<4x256xf32>
    %59 = arith.mulf %56, %58 : vector<4x256xf32>
    %60 = arith.addf %55, %59 : vector<4x256xf32>
    %61 = vector.extract_strided_slice %3 {offsets = [0, 18], sizes = [4, 256], strides = [1, 1]} : vector<4x290xf32> to vector<4x256xf32>
    %62 = vector.broadcast %28 : vector<1x256xf32> to vector<4x256xf32>
    %63 = arith.mulf %61, %62 : vector<4x256xf32>
    %c0_13 = arith.constant 0 : index
    %c5 = arith.constant 5 : index
    %64 = vector.load %arg2[%c0_13, %c5] : memref<4x9xf32, #tpu.memory_space<vmem>>, vector<4x1xf32>
    %65 = vector.broadcast %64 : vector<4x1xf32> to vector<4x256xf32>
    %66 = arith.mulf %63, %65 : vector<4x256xf32>
    %67 = arith.addf %60, %66 : vector<4x256xf32>
    %68 = vector.extract_strided_slice %3 {offsets = [0, 32], sizes = [4, 256], strides = [1, 1]} : vector<4x290xf32> to vector<4x256xf32>
    %69 = vector.broadcast %24 : vector<1x256xf32> to vector<4x256xf32>
    %70 = arith.mulf %68, %69 : vector<4x256xf32>
    %c0_14 = arith.constant 0 : index
    %c6 = arith.constant 6 : index
    %71 = vector.load %arg2[%c0_14, %c6] : memref<4x9xf32, #tpu.memory_space<vmem>>, vector<4x1xf32>
    %72 = vector.broadcast %71 : vector<4x1xf32> to vector<4x256xf32>
    %73 = arith.mulf %70, %72 : vector<4x256xf32>
    %74 = arith.addf %67, %73 : vector<4x256xf32>
    %75 = vector.extract_strided_slice %3 {offsets = [0, 33], sizes = [4, 256], strides = [1, 1]} : vector<4x290xf32> to vector<4x256xf32>
    %c0_15 = arith.constant 0 : index
    %c7 = arith.constant 7 : index
    %76 = vector.load %arg2[%c0_15, %c7] : memref<4x9xf32, #tpu.memory_space<vmem>>, vector<4x1xf32>
    %77 = vector.broadcast %76 : vector<4x1xf32> to vector<4x256xf32>
    %78 = arith.mulf %75, %77 : vector<4x256xf32>
    %79 = arith.addf %74, %78 : vector<4x256xf32>
    %80 = vector.extract_strided_slice %3 {offsets = [0, 34], sizes = [4, 256], strides = [1, 1]} : vector<4x290xf32> to vector<4x256xf32>
    %81 = vector.broadcast %28 : vector<1x256xf32> to vector<4x256xf32>
    %82 = arith.mulf %80, %81 : vector<4x256xf32>
    %c0_16 = arith.constant 0 : index
    %c8 = arith.constant 8 : index
    %83 = vector.load %arg2[%c0_16, %c8] : memref<4x9xf32, #tpu.memory_space<vmem>>, vector<4x1xf32>
    %84 = vector.broadcast %83 : vector<4x1xf32> to vector<4x256xf32>
    %85 = arith.mulf %82, %84 : vector<4x256xf32>
    %86 = arith.addf %79, %85 : vector<4x256xf32>
    %c0_17 = arith.constant 0 : index
    %c0_18 = arith.constant 0 : index
    %87 = vector.load %arg3[%c0_17, %c0_18] : memref<4x1xf32, #tpu.memory_space<vmem>>, vector<4x1xf32>
    %88 = vector.broadcast %87 : vector<4x1xf32> to vector<4x256xf32>
    %89 = arith.addf %86, %88 : vector<4x256xf32>
    %cst_19 = arith.constant 0.000000e+00 : f32
    %90 = vector.broadcast %cst_19 : f32 to vector<4x256xf32>
    %91 = arith.maximumf %89, %90 : vector<4x256xf32>
    %c0_20 = arith.constant 0 : index
    %c0_21 = arith.constant 0 : index
    %92 = vector.load %arg4[%c0_20, %c0_21] : memref<8x4xf32, #tpu.memory_space<vmem>>, vector<8x1xf32>
    %93 = vector.extract_strided_slice %91 {offsets = [0, 0], sizes = [1, 256], strides = [1, 1]} : vector<4x256xf32> to vector<1x256xf32>
    %94 = vector.broadcast %92 : vector<8x1xf32> to vector<8x256xf32>
    %95 = vector.broadcast %93 : vector<1x256xf32> to vector<8x256xf32>
    %96 = arith.mulf %94, %95 : vector<8x256xf32>
    %c0_22 = arith.constant 0 : index
    %c1_23 = arith.constant 1 : index
    %97 = vector.load %arg4[%c0_22, %c1_23] : memref<8x4xf32, #tpu.memory_space<vmem>>, vector<8x1xf32>
    %98 = vector.extract_strided_slice %91 {offsets = [1, 0], sizes = [1, 256], strides = [1, 1]} : vector<4x256xf32> to vector<1x256xf32>
    %99 = vector.broadcast %97 : vector<8x1xf32> to vector<8x256xf32>
    %100 = vector.broadcast %98 : vector<1x256xf32> to vector<8x256xf32>
    %101 = arith.mulf %99, %100 : vector<8x256xf32>
    %102 = arith.addf %96, %101 : vector<8x256xf32>
    %c0_24 = arith.constant 0 : index
    %c2_25 = arith.constant 2 : index
    %103 = vector.load %arg4[%c0_24, %c2_25] : memref<8x4xf32, #tpu.memory_space<vmem>>, vector<8x1xf32>
    %104 = vector.extract_strided_slice %91 {offsets = [2, 0], sizes = [1, 256], strides = [1, 1]} : vector<4x256xf32> to vector<1x256xf32>
    %105 = vector.broadcast %103 : vector<8x1xf32> to vector<8x256xf32>
    %106 = vector.broadcast %104 : vector<1x256xf32> to vector<8x256xf32>
    %107 = arith.mulf %105, %106 : vector<8x256xf32>
    %108 = arith.addf %102, %107 : vector<8x256xf32>
    %c0_26 = arith.constant 0 : index
    %c3_27 = arith.constant 3 : index
    %109 = vector.load %arg4[%c0_26, %c3_27] : memref<8x4xf32, #tpu.memory_space<vmem>>, vector<8x1xf32>
    %110 = vector.extract_strided_slice %91 {offsets = [3, 0], sizes = [1, 256], strides = [1, 1]} : vector<4x256xf32> to vector<1x256xf32>
    %111 = vector.broadcast %109 : vector<8x1xf32> to vector<8x256xf32>
    %112 = vector.broadcast %110 : vector<1x256xf32> to vector<8x256xf32>
    %113 = arith.mulf %111, %112 : vector<8x256xf32>
    %114 = arith.addf %108, %113 : vector<8x256xf32>
    %c0_28 = arith.constant 0 : index
    %c0_29 = arith.constant 0 : index
    %115 = vector.load %arg5[%c0_28, %c0_29] : memref<8x1xf32, #tpu.memory_space<vmem>>, vector<8x1xf32>
    %116 = vector.broadcast %115 : vector<8x1xf32> to vector<8x256xf32>
    %117 = arith.addf %114, %116 : vector<8x256xf32>
    %cst_30 = arith.constant 0.000000e+00 : f32
    %118 = vector.broadcast %cst_30 : f32 to vector<8x256xf32>
    %119 = arith.maximumf %117, %118 : vector<8x256xf32>
    %c0_31 = arith.constant 0 : index
    %c0_32 = arith.constant 0 : index
    %c0_33 = arith.constant 0 : index
    %120 = vector.load %arg6[%c0_31, %c0_32, %c0_33] : memref<1x8x256xf32, #tpu.memory_space<vmem>>, vector<1x8x256xf32>
    %121 = vector.shape_cast %120 : vector<1x8x256xf32> to vector<8x256xf32>
    %122 = vector.shape_cast %119 : vector<8x256xf32> to vector<1x8x256xf32>
    tpu.vector_store %arg6[%c0_31, %c0_32, %c0_33], %122 {strides = array<i32>} : memref<1x8x256xf32, #tpu.memory_space<vmem>>, vector<1x8x256xf32>,
    return
  }
  func.func @transform_0(%arg0: i32) -> (i32, i32, i32) {
    %c0_i32 = arith.constant 0 : i32
    %c0_i32_0 = arith.constant 0 : i32
    %c0_i32_1 = arith.constant 0 : i32
    return %arg0, %c0_i32, %c0_i32_0 : i32, i32, i32
  }
  func.func @transform_1(%arg0: i32) -> (i32, i32) {
    %c0_i32 = arith.constant 0 : i32
    %c0_i32_0 = arith.constant 0 : i32
    %c0_i32_1 = arith.constant 0 : i32
    return %c0_i32, %c0_i32_0 : i32, i32
  }
  func.func @transform_2(%arg0: i32) -> (i32, i32) {
    %c0_i32 = arith.constant 0 : i32
    %c0_i32_0 = arith.constant 0 : i32
    %c0_i32_1 = arith.constant 0 : i32
    return %c0_i32, %c0_i32_0 : i32, i32
  }
  func.func @transform_3(%arg0: i32) -> (i32, i32) {
    %c0_i32 = arith.constant 0 : i32
    %c0_i32_0 = arith.constant 0 : i32
    %c0_i32_1 = arith.constant 0 : i32
    return %c0_i32, %c0_i32_0 : i32, i32
  }
  func.func @transform_4(%arg0: i32) -> (i32, i32) {
    %c0_i32 = arith.constant 0 : i32
    %c0_i32_0 = arith.constant 0 : i32
    %c0_i32_1 = arith.constant 0 : i32
    return %c0_i32, %c0_i32_0 : i32, i32
  }
  func.func @transform_5(%arg0: i32) -> (i32, i32, i32) {
    %c0_i32 = arith.constant 0 : i32
    %c0_i32_0 = arith.constant 0 : i32
    %c0_i32_1 = arith.constant 0 : i32
    return %arg0, %c0_i32, %c0_i32_0 : i32, i32, i32
  }
}

</mosaic_0001>

<bundles_post_ra>
// kernel: tpu_custom_call.1
= control target key start
LH: loop header
LB: loop body
LE: loop exit
PB: predicated region body
PF: predicated region fallthrough
CT: control target
= control target key end

     0   :  { %10 = vsyncpa [#allocation3], 0  ;;  %s1124_s0 = inlined_call_operand.vmem [shape: f32[2,4,256], index: 0, kind: input, shape index: {}]   ;;  %s1125_s1 = inlined_call_operand.vmem [shape: f32[4,9], index: 1, kind: input, shape index: {}]   ;;  %s1126_s2 = inlined_call_operand.vmem [shape: f32[4,1], index: 2, kind: input, shape index: {}]   ;;  %s1127_s3 = inlined_call_operand.vmem [shape: f32[8,4], index: 3, kind: input, shape index: {}]   ;;  %s1128_s4 = inlined_call_operand.vmem [shape: f32[8,1], index: 4, kind: input, shape index: {}]   ;;  %s1129_s5 = inlined_call_operand.hbm [shape: f32[2,8,256], index: 5, kind: output, shape index: {}]  }
   0x1   :  { %12 = vsyncpa [#allocation3 + $0x1], 0  ;;  %s933_s18 = smov 0   ;;  %s935_s19 = smov 0  }
   0x2   :  { %s937_s20 = smov 0   ;;  %s939_s21 = smov 0  }
   0x3 LB: > { %s954_s22 = sadd.s32 4294967295, %s876_s21   ;;  %s696_s23 = sadd.s32 4294967294, %s876_s21   ;;  %s876_s21 = sphi %s939_s21, %s1135_s21   ;;  %s872_s20 = sphi %s937_s20, %s1134_s20   ;;  %s868_s19 = sphi %s935_s19, %s1133_s19   ;;  %s864_s18 = sphi %s933_s18, %s1132_s18  }
   0x4   : > { %s958_s24 = sadd.s32 1, %s876_s21   ;;  %s135_s25 = sadd.s32 1, %s872_s20 }
   0x5   : > { %s132_s26 = ssub.s32 %s876_s21, %s958_s24  ;;  %p145_p0 = scmp.ne.s32.totalorder %s872_s20, %s868_s19 }
   0x6   : > { %p133_p1 = scmp.eq.s32.totalorder %s132_s26, 0  ;;  %p146_p2 = scmp.eq.s32.totalorder %s954_s22, 1 }
   0x7   : > { %p151_p3 = scmp.ne.s32.totalorder %s868_s19, %s864_s18  ;;  %p152_p4 = scmp.eq.s32.totalorder %s696_s23, 1 }
   0x8   : > { %s969_s27 = scalar_select %p133_p1, %s872_s20, %s135_s25  }
   0x9   : > { %p971_p5 = por %p146_p2, %p145_p0  ;;  %p975_p6 = por %p152_p4, %p151_p3 }
   0xa   : > { %p699_p7 = scmp.ge.s32.totalorder %s876_s21, 1  ;;  %p190_p8 = scmp.lt.s32.totalorder %s876_s21, 3 }
   0xc   : > { %p191_p9 = pnand %p699_p7, %p190_p8 }
   0xd   : > { %p218_p10 = scmp.lt.s32.totalorder (!%p191_p9), %s954_s22, 1  ;;  %s881_s12 = smov (!%p191_p9), 17  }
   0xe   : > { %194 = sbr.rel (%p191_p9) target bundleno = 362 (0x16a), region = 40  ;;  %s884_s13 = smov (!%p191_p9), 2  }
   0xf   : > { %s886_s14 = smov (!%p191_p9), 16   ;;  %s887_s15 = smov (!%p191_p9), 32  }
  0x10   : > { %s889_s16 = smov (!%p191_p9), 18   ;;  %s892_s17 = smov (!%p191_p9), 34  }
  0x11   : > { %s894_s26 = smov (!%p191_p9), 127   ;;  %s895_s30 = smov (!%p191_p9), 126  }
  0x12   : > { %s896_s6 = smov (!%p191_p9), 112   ;;  %s899_s9 = smov (!%p191_p9), 96  }
  0x13   : > { %v278_v0 = vld [vmem:[%s1125_s1] sm:$0xf]  ;;  %v237_v1 = vlaneseq  ;;  %v878_v2 = vmov 1   ;;  %s219_s7 = scalar_select %p218_p10, %s954_s22, 1  ;;  %v879_v4 = vmov 4   ;;  %v880_v7 = vmov 2  }
  0x14   : > { %777 = vset.pattern.permute.xlu0 %v878_v2  ;;  %790 = vset.pattern.permute.xlu1 %v879_v4  ;;  %v882_v11 = vmov 0.0   ;;  %v883_v14 = vmov 3   ;;  %v885_v19 = vmov 5   ;;  %v888_v20 = vmov 8   ;;  %v536_v24 = vld [vmem:[%s1126_s2] sm:$0xf] }
  0x15   : > { %289 = vperm.xlu0 %777, %v278_v0   ;;  %v238_v3 = vand.u32 127, %v237_v1  ;;  %s712_s8 = sshll.u32 %s219_s7, 3  ;;  %v890_v21 = vmov 6   ;;  %v891_v22 = vmov 7   ;;  %v893_v23 = vmov 0   ;;  %s897_s7 = smov 111  }
  0x16   : > { %s222_s11 = scalar_lea.vmem %s1124_s0, %s712_s8  ;;  %vm230_vm4 = vcmask 138240   ;;  %s898_s8 = smov 110   ;;  %vm354_vm5 = vcmask 130048   ;;  %vm317_vm6 = vcmask 15360   ;;  %vm412_vm7 = vcmask 146432  }
  0x17   : > { %v239_v5 = vadd.s32 128, %v238_v3  ;;  %v244_v6 = vand.u32 15, %v238_v3  ;;  %v223_v8 = vld [vmem:[%s222_s11] sm:$0xff]  ;;  %s900_s10 = smov 95   ;;  %vm505_vm8 = vcmask 277504   ;;  %vm447_vm9 = vcmask 261120  }
  0x18   : > { %226 = vrot.lane.b32.xlu1 %v223_v8, %s881_s12  ;;  %v225_v10 = vcombine.high %v223_v8, %v223_v8  ;;  %vm304_vm10 = vcmask 1039360   ;;  %vm341_vm11 = vcmask 1031168   ;;  %vm378_vm12 = vcmask 916480   ;;  %s713_s23 = sshll.u32 %s954_s22, 8  ;;  %s902_s22 = smov [#allocation2]  }
  0x19   : > { %778 = vset.pattern.permute.xlu0 %v880_v7  ;;  %v251_v9 = vand.u32 15, %v239_v5  ;;  %vm270_vm0 = vcmp.le.s32.totalorder %v244_v6, 14  ;;  %vm264_vm2 = vcmp.ge.s32.totalorder %v244_v6, 1  ;;  %vm401_vm13 = vcmask 908288  }
  0x1a   : > { %326 = vperm.xlu0 %778, %v278_v0   ;;  %v705_v12 = vsel %vm270_vm0, 1.0, %v882_v11  ;;  %v992_v16 = vsel %vm264_vm2, 1.0, %v882_v11  ;;  %vm436_vm14 = vcmask 900096   ;;  %vm471_vm15 = vcmask 785408  }
  0x1b   : > { %vm271_vm1 = vcmp.le.s32.totalorder %v251_v9, 14  ;;  %vm265_vm3 = vcmp.ge.s32.totalorder %v251_v9, 1  ;;  %vm494_vm0 = vcmask 777216  }
  0x1c   : > { %v706_v13 = vsel %vm271_vm1, 1.0, %v882_v11  ;;  %228 = vrot.lane.b32.xlu1 %v225_v10, %s881_s12  ;;  %v994_v17 = vsel %vm265_vm3, 1.0, %v882_v11  ;;  %vm529_vm1 = vcmask 769024  }
  0x1d   : > { %v780_v15 = vpack.i.bf16 %v706_v13, %v705_v12  ;;  %v785_v18 = vpack.i.bf16 %v994_v17, %v992_v16 }
  0x1e   : > { %779 = vset.pattern.permute.xlu0 %v883_v14 }
  0x1f   : > { %363 = vperm.xlu0 %779, %v278_v0  }
  0x20   : > { %781 = vrot.lane.b32.xlu1 %v780_v15, %s884_s13  ;;  %s901_s13 = smov 94  }
  0x23   : > { %791 = vset.pattern.permute.xlu0 %v885_v19 }
  0x24   : > { %421 = vperm.xlu0 %791, %v278_v0   ;;  %786 = vrot.lane.b32.xlu1 %v785_v18, %s886_s14 }
  0x28   : > { %799 = vrot.lane.b32.xlu0 %v785_v18, %s887_s15  ;;  %386 = vperm.xlu1 %790, %v278_v0  }
  0x29   : > { %804 = vset.pattern.permute.xlu0 %v888_v20 }
  0x2c   : > { %514 = vperm.xlu0 %804, %v278_v0   ;;  %793 = vrot.lane.b32.xlu1 %v780_v15, %s889_s16  ;;  %s215_s16 = sand.u32 1, %s868_s19  }
  0x2d   : > { %797 = vset.pattern.permute.xlu1 %v890_v21 }
  0x30   : > { %811 = vset.pattern.permute.xlu0 %v878_v2  ;;  %456 = vperm.xlu1 %797, %v278_v0  }
  0x34   : > { %803 = vset.pattern.permute.xlu1 %v891_v22 }
  0x35   : > { %479 = vperm.xlu1 %803, %v278_v0  }
  0x39   : > { %806 = vrot.lane.b32.xlu1 %v780_v15, %s892_s17  ;;  %s700_s17 = sshll.u32 %s215_s16, 4 }
  0x3a   : > { %810 = vset.pattern.permute.xlu1 %v893_v23  ;;  %s217_s25 = scalar_lea.vmem [#allocation2], %s700_s17 }
  0x3d   : > { %281 = vperm.xlu1 %810, %v278_v0  }
  0x41   : > { %539 = vperm.xlu1 %810, %v536_v24  }
  0x8a   : > { %v227_v25 = vpop.permute.xlu1 %226 }
  0x8b   : > { %v1002_v26 = vsel %vm230_vm4, 0.0, %v227_v25 }
  0x8e   : > { %v229_v28 = vpop.permute.xlu1 %228 }
  0x8f   : > { %v1005_v30 = vsel %vm230_vm4, %v227_v25, %v229_v28  ;;  %v1007_v31 = vsel %vm230_vm4, %v229_v28, 0.0 }
  0x90   : > { %v290_v27 = vpop.permute.xlu0 %289 }
  0x91   : > { %v292_v29 = vmul.f32 %v290_v27, %v1002_v26  ;;  %v293_v32 = vmul.f32 %v290_v27, %v1005_v30  ;;  %v294_v36 = vmul.f32 %v290_v27, %v1007_v31 }
  0x92   : > { %v782_v33 = vpop.permute.xlu1 %781 }
  0x93   : > { %298 = vrot.lane.b32.xlu0 %v292_v29, %s894_s26  ;;  %300 = vrot.lane.b32.xlu1 %v293_v32, %s894_s26  ;;  %v783_v34 = vunpack.i.l.bf16 %v782_v33  ;;  %v784_v58 = vunpack.i.h.bf16 %v782_v33 }
  0x95   : > { %v1010_v35 = vpop.permute.xlu0 %326  ;;  %v322_v37 = vmul.f32 %v783_v34, %v1002_v26  ;;  %v324_v60 = vmul.f32 %v784_v58, %v1007_v31  ;;  %v318_v9 = vsel %vm317_vm6, %v783_v34, %v784_v58  ;;  %v276_v58 = vmul.f32 %v992_v16, %v1002_v26 }
  0x96   : > { %v787_v38 = vpop.permute.xlu1 %786  ;;  %v323_v19 = vmul.f32 %v318_v9, %v1005_v30 }
  0x97   : > { %302 = vrot.lane.b32.xlu0 %v294_v36, %s894_s26  ;;  %v329_v39 = vmul.f32 %v1010_v35, %v322_v37  ;;  %v788_v40 = vunpack.i.l.bf16 %v787_v38  ;;  %v789_v61 = vunpack.i.h.bf16 %v787_v38  ;;  %v331_v2 = vmul.f32 %v1010_v35, %v324_v60  ;;  %v546_v36 = vld [vmem:[%s1127_s3] sm:$0xff]  ;;  %s637_s26 = sshll.u32 %s217_s25, 4  ;;  %s638_s26 = int_to_ptr.vmem [resolvable:$true] %s637_s26 }
  0x98   : > { %v330_v27 = vmul.f32 %v1010_v35, %v323_v19 }
  0x99   : > { %v359_v42 = vmul.f32 %v788_v40, %v1002_v26  ;;  %335 = vrot.lane.b32.xlu1 %v329_v39, %s895_s30  ;;  %v361_v3 = vmul.f32 %v789_v61, %v1007_v31  ;;  %v355_v6 = vsel %vm354_vm5, %v788_v40, %v789_v61 }
  0x9a   : > { %v364_v41 = vpop.permute.xlu0 %363  ;;  %v360_v10 = vmul.f32 %v355_v6, %v1005_v30 }
  0x9b   : > { %v366_v43 = vmul.f32 %v364_v41, %v359_v42  ;;  %v368_v11 = vmul.f32 %v364_v41, %v361_v3 }
  0x9c   : > { %v367_v20 = vmul.f32 %v364_v41, %v360_v10 }
  0x9d   : > { %372 = vrot.lane.b32.xlu0 %v366_v43, %s896_s6  ;;  %v610_v43 = vld [vmem:[%s1128_s4] sm:$0xff] }
  0x9f   : > { %v1017_v44 = vpop.permute.xlu0 %421 }
  0xa3   : > { %v1020_v45 = vpop.permute.xlu0 %799  ;;  %v387_v46 = vpop.permute.xlu1 %386 }
  0xa4   : > { %v389_v47 = vmul.f32 %v387_v46, %v1002_v26  ;;  %v390_v48 = vmul.f32 %v387_v46, %v1005_v30  ;;  %v801_v49 = vunpack.i.l.bf16 %v1020_v45  ;;  %v391_v51 = vmul.f32 %v387_v46, %v1007_v31 }
  0xa5   : > { %v802_v0 = vunpack.i.h.bf16 %v1020_v45 }
  0xa6   : > { %395 = vrot.lane.b32.xlu1 %v389_v47, %s897_s7  ;;  %397 = vrot.lane.b32.xlu0 %v390_v48, %s897_s7  ;;  %v452_v53 = vmul.f32 %v801_v49, %v1002_v26 }
  0xa7   : > { %v794_v50 = vpop.permute.xlu1 %793  ;;  %v454_v8 = vmul.f32 %v802_v0, %v1007_v31  ;;  %v515_v33 = vpop.permute.xlu0 %514  ;;  %v448_v34 = vsel %vm447_vm9, %v801_v49, %v802_v0 }
  0xa8   : > { %v795_v52 = vunpack.i.l.bf16 %v794_v50  ;;  %v796_v4 = vunpack.i.h.bf16 %v794_v50  ;;  %v453_v38 = vmul.f32 %v448_v34, %v1005_v30 }
  0xaa   : > { %v417_v54 = vmul.f32 %v795_v52, %v1002_v26  ;;  %399 = vrot.lane.b32.xlu1 %v391_v51, %s897_s7  ;;  %v419_v12 = vmul.f32 %v796_v4, %v1007_v31  ;;  %v413_v15 = vsel %vm412_vm7, %v795_v52, %v796_v4  ;;  %s1087_s7 = scalar_lea.hbm %s1129_s5, %s713_s23 }
  0xab   : > { %v457_v55 = vpop.permute.xlu1 %456  ;;  %v418_v24 = vmul.f32 %v413_v15, %v1005_v30 }
  0xac   : > { %v459_v56 = vmul.f32 %v457_v55, %v452_v53  ;;  %v424_v57 = vmul.f32 %v1017_v44, %v417_v54  ;;  %v461_v13 = vmul.f32 %v457_v55, %v454_v8  ;;  %v426_v22 = vmul.f32 %v1017_v44, %v419_v12 }
  0xad   : > { %v425_v29 = vmul.f32 %v1017_v44, %v418_v24  ;;  %v460_v39 = vmul.f32 %v457_v55, %v453_v38 }
  0xae   : > { %430 = vrot.lane.b32.xlu0 %v424_v57, %s898_s8  ;;  %465 = vrot.lane.b32.xlu1 %v459_v56, %s899_s9 }
  0xb0   : > { %v480_v59 = vpop.permute.xlu1 %479 }
  0xb1   : > { %v482_v62 = vmul.f32 %v480_v59, %v1002_v26  ;;  %v483_v63 = vmul.f32 %v480_v59, %v1005_v30  ;;  %v484_v5 = vmul.f32 %v480_v59, %v1007_v31  ;;  %v277_v59 = vmul.f32 %v994_v17, %v1005_v30 }
  0xb3   : > { %488 = vrot.lane.b32.xlu0 %v482_v62, %s900_s10  ;;  %490 = vrot.lane.b32.xlu1 %v483_v63, %s900_s10 }
  0xb4   : > { %v807_v18 = vpop.permute.xlu1 %806 }
  0xb5   : > { %v808_v21 = vunpack.i.l.bf16 %v807_v18  ;;  %v809_v25 = vunpack.i.h.bf16 %v807_v18 }
  0xb7   : > { %492 = vrot.lane.b32.xlu0 %v484_v5, %s900_s10  ;;  %339 = vrot.lane.b32.xlu1 %v331_v2, %s895_s30  ;;  %v510_v28 = vmul.f32 %v808_v21, %v1002_v26  ;;  %v506_v32 = vsel %vm505_vm8, %v808_v21, %v809_v25  ;;  %v512_v40 = vmul.f32 %v809_v25, %v1007_v31  ;;  %s820_s10 = sshll.u32 %s902_s22, 4  ;;  %s821_s10 = int_to_ptr.vmem [resolvable:$false] %s820_s10 }
  0xb8   : > { %v511_v35 = vmul.f32 %v506_v32, %v1005_v30  ;;  %v282_v31 = vpop.permute.xlu1 %281  ;;  %s822_s11 = scalar_lea.vmem %s821_s10, 512  ;;  %p823_p0 = scmp.lt.s32.totalorder %s638_s26, %s821_s10 }
  0xb9   : > { %v517_v37 = vmul.f32 %v515_v33, %v510_v28  ;;  %v519_v42 = vmul.f32 %v515_v33, %v512_v40  ;;  %v284_v63 = vmul.f32 %v282_v31, %v276_v58  ;;  %v285_v0 = vmul.f32 %v282_v31, %v277_v59 }
  0xba   : > { %v518_v41 = vmul.f32 %v515_v33, %v511_v35  ;;  %v553_v40 = vshrl.u32 %v237_v1, 7 }
  0xbb   : > { %376 = vrot.lane.b32.xlu0 %v368_v11, %s896_s6  ;;  %469 = vrot.lane.b32.xlu1 %v461_v13, %s899_s9 }
  0xbc   : > { %v1071_v44 = vpop.permute.xlu1 %539 }
  0xbf   : > { %434 = vrot.lane.b32.xlu0 %v426_v22, %s898_s8  ;;  %374 = vrot.lane.b32.xlu1 %v367_v20, %s896_s6 }
  0xc3   : > { %432 = vrot.lane.b32.xlu1 %v425_v29, %s898_s8  ;;  %337 = vrot.lane.b32.xlu0 %v330_v27, %s895_s30  ;;  %s623_s8 = scalar_lea.sflag [#allocation3], %s215_s16 }
  0xc7   : > { %549 = vperm.xlu1 %810, %v546_v36   ;;  %523 = vrot.lane.b32.xlu0 %v517_v37, %s901_s13 }
  0xcb   : > { %525 = vrot.lane.b32.xlu1 %v518_v41, %s901_s13  ;;  %467 = vrot.lane.b32.xlu0 %v460_v39, %s899_s9  ;;  %s816_s9 = scalar_lea.vmem %s638_s26, 256 }
  0xcc   : > { %812 = vset.pattern.permute.xlu1 %v880_v7  ;;  %p817_p11 = scmp.ne.s32.totalorder %s638_s26, %s816_s9  ;;  %p824_p1 = scmp.lt.s32.totalorder %s822_s11, %s816_s9 }
  0xce   : > { %p818_p12 = pnand %p817_p11, %p971_p5  ;;  %p825_p2 = por %p824_p1, %p823_p0 }
  0xcf   : > { %579 = vperm.xlu1 %812, %v546_v36   ;;  %527 = vrot.lane.b32.xlu0 %v519_v42, %s901_s13 }
  0xd0   : > { %p819_p13 = pneg %p818_p12 }
  0xd2   : > { %p826_p3 = pnand %p825_p2, %p819_p13 }
  0xd3   : > { %813 = vset.pattern.permute.xlu1 %v883_v14  ;;  %563 = vperm.xlu0 %811, %v546_v36  }
  0xd4   : > { %595 = vperm.xlu1 %813, %v546_v36  }
  0xd7   : > { %814 = vset.pattern.permute.xlu0 %v893_v23 }
  0xd8   : > { %613 = vperm.xlu0 %814, %v610_v43  }
 0x105   : > { %v299_v45 = vpop.permute.xlu0 %298  ;;  %v301_v46 = vpop.permute.xlu1 %300 }
 0x106   : > { %v305_v61 = vsel %vm304_vm10, %v299_v45, %v301_v46 }
 0x107   : > { %v309_v3 = vadd.f32 %v305_v61, %v284_v63 }
 0x109   : > { %v303_v7 = vpop.permute.xlu0 %302 }
 0x10a   : > { %v306_v62 = vsel %vm304_vm10, %v301_v46, %v303_v7  ;;  %v584_v7 = vsub.s32 2, %v553_v40 }
 0x10b   : > { %v336_v47 = vpop.permute.xlu1 %335  ;;  %v310_v4 = vadd.f32 %v306_v62, %v285_v0 }
 0x10f   : > { %v373_v48 = vpop.permute.xlu0 %372 }
 0x118   : > { %v396_v49 = vpop.permute.xlu1 %395  ;;  %v398_v50 = vpop.permute.xlu0 %397 }
 0x119   : > { %v402_v12 = vsel %vm401_vm13, %v396_v49, %v398_v50 }
 0x11c   : > { %v400_v14 = vpop.permute.xlu1 %399 }
 0x11d   : > { %v403_v13 = vsel %vm401_vm13, %v398_v50, %v400_v14 }
 0x120   : > { %v431_v51 = vpop.permute.xlu0 %430  ;;  %v466_v52 = vpop.permute.xlu1 %465 }
 0x125   : > { %v489_v53 = vpop.permute.xlu0 %488  ;;  %v491_v54 = vpop.permute.xlu1 %490 }
 0x126   : > { %v495_v34 = vsel %vm494_vm0, %v489_v53, %v491_v54 }
 0x129   : > { %v493_v55 = vpop.permute.xlu0 %492  ;;  %v340_v56 = vpop.permute.xlu1 %339 }
 0x12a   : > { %v496_v36 = vsel %vm494_vm0, %v491_v54, %v493_v55 }
 0x12d   : > { %v377_v57 = vpop.permute.xlu0 %376  ;;  %v470_v23 = vpop.permute.xlu1 %469 }
 0x131   : > { %v435_v60 = vpop.permute.xlu0 %434  ;;  %v375_v2 = vpop.permute.xlu1 %374 }
 0x132   : > { %v379_v16 = vsel %vm378_vm12, %v373_v48, %v375_v2  ;;  %v380_v26 = vsel %vm378_vm12, %v375_v2, %v377_v57  ;;  %v568_v48 = vsub.s32 1, %v553_v40 }
 0x135   : > { %v338_v5 = vpop.permute.xlu0 %337  ;;  %v433_v15 = vpop.permute.xlu1 %432 }
 0x136   : > { %v342_v6 = vsel %vm341_vm11, %v336_v47, %v338_v5  ;;  %v343_v8 = vsel %vm341_vm11, %v338_v5, %v340_v56  ;;  %v437_v20 = vsel %vm436_vm14, %v431_v51, %v433_v15  ;;  %v438_v21 = vsel %vm436_vm14, %v433_v15, %v435_v60 }
 0x137   : > { %v346_v9 = vadd.f32 %v342_v6, %v309_v3  ;;  %v347_v10 = vadd.f32 %v343_v8, %v310_v4  ;;  %v554_v47 = vsub.s32 0, %v553_v40  ;;  %v600_v51 = vsub.s32 3, %v553_v40 }
 0x139   : > { %v383_v11 = vadd.f32 %v379_v16, %v346_v9  ;;  %v384_v17 = vadd.f32 %v380_v26, %v347_v10  ;;  %v524_v30 = vpop.permute.xlu0 %523 }
 0x13b   : > { %v406_v18 = vadd.f32 %v402_v12, %v383_v11  ;;  %v407_v19 = vadd.f32 %v403_v13, %v384_v17 }
 0x13d   : > { %v468_v22 = vpop.permute.xlu0 %467  ;;  %v441_v24 = vadd.f32 %v437_v20, %v406_v18  ;;  %v442_v25 = vadd.f32 %v438_v21, %v407_v19 }
 0x13e   : > { %v472_v27 = vsel %vm471_vm15, %v466_v52, %v468_v22  ;;  %v473_v28 = vsel %vm471_vm15, %v468_v22, %v470_v23 }
 0x13f   : > { %v476_v29 = vadd.f32 %v472_v27, %v441_v24  ;;  %v477_v32 = vadd.f32 %v473_v28, %v442_v25 }
 0x141   : > { %v528_v35 = vpop.permute.xlu0 %527  ;;  %v499_v38 = vadd.f32 %v495_v34, %v476_v29  ;;  %v500_v39 = vadd.f32 %v496_v36, %v477_v32 }
 0x142   : > { %v550_v33 = vpop.permute.xlu1 %549 }
 0x146   : > { %v526_v37 = vpop.permute.xlu1 %525 }
 0x147   : > { %v530_v41 = vsel %vm529_vm1, %v524_v30, %v526_v37  ;;  %v531_v42 = vsel %vm529_vm1, %v526_v37, %v528_v35 }
 0x148   : > { %v534_v43 = vadd.f32 %v530_v41, %v499_v38  ;;  %v535_v31 = vadd.f32 %v531_v42, %v500_v39 }
 0x14a   : > { %v542_v45 = vadd.f32 %v1071_v44, %v534_v43  ;;  %v543_v46 = vadd.f32 %v1071_v44, %v535_v31  ;;  %v580_v14 = vpop.permute.xlu1 %579 }
 0x14c   : > { %v544_v49 = vmax.f32 %v542_v45, 0.0  ;;  %v545_v50 = vmax.f32 %v543_v46, 0.0 }
 0x14e   : > { %v585_v52 = vrot.slane %v544_v49, %v584_v7  ;;  %v589_v53 = vrot.slane %v545_v50, %v584_v7  ;;  %v564_v1 = vpop.permute.xlu0 %563  ;;  %v555_v54 = vrot.slane %v544_v49, %v554_v47  ;;  %v559_v55 = vrot.slane %v545_v50, %v554_v47 }
 0x14f   : > { %v569_v56 = vrot.slane %v544_v49, %v568_v48  ;;  %v573_v57 = vrot.slane %v545_v50, %v568_v48  ;;  %v601_v23 = vrot.slane %v544_v49, %v600_v51  ;;  %v605_v58 = vrot.slane %v545_v50, %v600_v51  ;;  %v596_v62 = vpop.permute.xlu1 %595 }
 0x150   : > { %v560_v59 = vmul.f32 %v555_v54, %v550_v33  ;;  %v561_v44 = vmul.f32 %v559_v55, %v550_v33  ;;  %v590_v63 = vmul.f32 %v585_v52, %v580_v14  ;;  %v591_v0 = vmul.f32 %v589_v53, %v580_v14 }
 0x151   : > { %v574_v60 = vmul.f32 %v569_v56, %v564_v1  ;;  %v575_v61 = vmul.f32 %v573_v57, %v564_v1  ;;  %v606_v4 = vmul.f32 %v601_v23, %v596_v62  ;;  %v607_v5 = vmul.f32 %v605_v58, %v596_v62 }
 0x153   : > { %v576_v2 = vadd.f32 %v574_v60, %v560_v59  ;;  %v577_v3 = vadd.f32 %v575_v61, %v561_v44  ;;  %v614_v9 = vpop.permute.xlu0 %613 }
 0x155   : > { %v592_v6 = vadd.f32 %v590_v63, %v576_v2  ;;  %v593_v8 = vadd.f32 %v591_v0, %v577_v3 }
 0x157   : > { %v608_v10 = vadd.f32 %v606_v4, %v592_v6  ;;  %v609_v16 = vadd.f32 %v607_v5, %v593_v8 }
 0x159   : > { %v616_v26 = vadd.f32 %v614_v9, %v608_v10  ;;  %v617_v11 = vadd.f32 %v614_v9, %v609_v16 }
 0x15b   : > { %v618_v17 = vmax.f32 %v616_v26, 0.0  ;;  %v619_v30 = vmax.f32 %v617_v11, 0.0 }
 0x15d   : > { %620 = vst [vmem:[%s217_s25] sm:$0xff] %v618_v17  ;;  %621 = vst [vmem:[%s217_s25 + $0x8] sm:$0xff] %v619_v30 }
 0x15e   : > { %829 = shalt.err (!%p826_p3)
}
 0x15f   : > { %s830_s12 = scalar_lea.hbm %s1087_s7, 256  ;;  %s834_s15 = scalar_lea.hbm %s1129_s5, 512 }
 0x160   : > { %p831_p4 = scmp.ne.s32.totalorder %s1087_s7, %s830_s12  ;;  %p835_p9 = scmp.lt.s32.totalorder %s1087_s7, %s1129_s5 }
 0x161   : > { %p836_p10 = scmp.lt.s32.totalorder %s834_s15, %s830_s12 }
 0x162   : > { %p832_p7 = pnand %p831_p4, %p971_p5 }
 0x163   : > { %p837_p11 = por %p836_p10, %p835_p9 }
 0x164   : > { %p833_p8 = pneg %p832_p7 }
 0x166   : > { %p838_p12 = pnand %p837_p11, %p833_p8 }
 0x168   : > { %841 = shalt.err (!%p838_p12)
}
 0x169   : > { %714 = dma.vmem_to_hbm [thread:$0]  (%p971_p5), %s638_s26, 256, %s1087_s7, %s623_s8  }
 0x16a PF: > { %p720_p13 = scmp.ge.s32.totalorder %s876_s21, 2  ;;  %s649_s23 = sand.u32 1, %s864_s18  }
 0x16b   : > { %s650_s25 = scalar_lea.sflag [#allocation3], %s649_s23 }
 0x16c   : > { %p717_p0 = pnand %p720_p13, %p975_p6 }
 0x16e   : > { %p718_p1 = pneg %p717_p0 }
 0x170   : > { %859 = dma.done.wait (%p718_p1), %s650_s25, 256  }
 0x171   : > { %861 = vsyncadd (%p718_p1), %s650_s25, 4294967040  ;;  %p15_p2 = scmp.ge.s32.totalorder %s958_s24, 4   ;;  %s1132_s18 = smov %s868_s19 }
 0x172   : > { %s1133_s19 = smov %s872_s20  ;;  %s1134_s20 = smov %s969_s27 }
 0x173   : > { %s1135_s21 = smov %s958_s24  ;;  %17 = sbr.rel (!%p15_p2) target bundleno = 3 (0x3), region = 75 }
 0x178   :  { %655 = vsyncpa [#allocation3], 1 }
 0x179   :  { %657 = vsyncpa [#allocation3 + $0x1], 1 }

</bundles_post_ra>
